<compile_context>
chip_gen: v6e
topology: v6e:2x2x1
jax: 0.10.0
libtpu: 0.0.40
codegen_flags: <defaults>
</compile_context>

<pallas_src>
import jax
import jax.numpy as jnp
from jax.experimental import pallas as pl
from jax.experimental.pallas import tpu as pltpu


def _pick_batch_tile(batch: int, seq: int, target_m: int = 512) -> int:
    """Rows per grid step so the flattened matmul M = bt*seq is ~target_m."""
    if batch * seq <= target_m:
        return batch
    for bt in range(batch, 0, -1):
        if batch % bt:
            continue
        m = bt * seq
        if m <= target_m and m % 8 == 0:       # keep the block sublane-aligned
            return bt
    return batch                               # no good divisor -> full batch


def _pick_k_tile(e: int, k_tile: int = 512) -> int:
    """Largest divisor of E that is a multiple of 128 and <= k_tile (else full E)."""
    if e <= k_tile:
        return e
    start = k_tile - (k_tile % 128)
    for tk in range(start, 0, -128):
        if e % tk == 0:
            return tk
    # TODO(synk): no 128-multiple divisor -> full-width weight tile stays resident
    # (no K pipelining); pad E in the wrapper if this becomes a real configuration.
    return e


def make_adapter_kernel(normalize: bool, max_dim: int, has_dims: bool):
    """Build the kernel. `normalize` / `max_dim` / `has_dims` are static flags."""

    def body(emb_ref, wpool_ref, dims_ref, w_ref, b_ref, out_ref, acc_ref):
        k = pl.program_id(1)
        nk = pl.num_programs(1)
        bt, seq = wpool_ref.shape
        hidden = out_ref.shape[1]

        # ---- synthetic backbone matmul: [bt*S, tk] @ [tk, H] on the MXU, f32 acc ----
        prod = jnp.dot(emb_ref[...], w_ref[...], preferred_element_type=jnp.float32)

        @pl.when(k == 0)
        def _first():
            # Direct write with bias folded in: no zero-fill / read-modify-write pass.
            acc_ref[...] = prod + b_ref[...].astype(jnp.float32)

        @pl.when(k > 0)
        def _accum():
            acc_ref[...] += prod

        @pl.when(k == nk - 1)
        def _epilogue():
            # HF model emits bf16 last_hidden_state; the adapter does .to(float32).
            hid = acc_ref[...].astype(jnp.bfloat16).astype(jnp.float32)
            hid = hid.reshape(bt, seq, hidden)

            # ---- "avg" pooling: VPU multiply + sublane reduce over S ----
            # pool weights = mask / num_tokens, precomputed in the wrapper.
            pooled = jnp.sum(hid * wpool_ref[...][:, :, None], axis=1)      # [bt, H]

            col = None
            if has_dims or (normalize and max_dim < hidden):
                col = jax.lax.broadcasted_iota(jnp.int32, (bt, hidden), 1)

            # ---- Matryoshka dimension masking: cols >= dims[b] -> -inf ----
            if has_dims:
                pooled = jnp.where(col >= dims_ref[...], jnp.float32(-jnp.inf), pooled)

            # ---- F.normalize(p=2, dim=1) over the first max_dim columns ----
            if normalize:
                sq = pooled * pooled
                if max_dim < hidden:     # torch slices [:, :max_dim] before normalize
                    sq = jnp.where(col < max_dim, sq, jnp.float32(0.0))
                nsq = jnp.sum(sq, axis=1, keepdims=True)                     # [bt, 1]
                eps = jnp.float32(1e-12)
                inv = jnp.where(nsq >= eps * eps,
                                jax.lax.rsqrt(nsq),              # EUP, not VALU divide
                                jnp.float32(1e12))               # torch x/eps branch
                pooled = pooled * inv

            out_ref[...] = pooled                                # lane-dense [bt, H]

    if has_dims:
        def kernel(emb_ref, wpool_ref, dims_ref, w_ref, b_ref, out_ref, acc_ref):
            body(emb_ref, wpool_ref, dims_ref, w_ref, b_ref, out_ref, acc_ref)
    else:
        def kernel(emb_ref, wpool_ref, w_ref, b_ref, out_ref, acc_ref):
            body(emb_ref, wpool_ref, None, w_ref, b_ref, out_ref, acc_ref)
    return kernel


def llama_bidirectional_adapter(
    input_ids,
    attention_mask,
    params,
    *,
    dimensions=None,
    max_dim=None,
    token_type_ids=None,
    normalize=True,
    batch_tile=None,
    k_tile=512,
    target_m=512,
):
    """JAX/Pallas equivalent of LlamaBidirectionalHFAdapter.forward."""
    # TODO(synk): token_type_ids accepted but ignored (synthetic backbone has no
    # token-type embedding table, same as a plain Llama model).
    del token_type_ids

    embed_table, w, bias = params
    B, S = input_ids.shape
    E = embed_table.shape[1]
    H = w.shape[1]

    # Glue (backbone input layer + pooling prep), done once in XLA.
    # TODO(synk): for huge B*S*E the gather could be fused into the kernel via
    # scalar-prefetched ids + pl.Element gather to avoid materializing [B*S, E].
    emb = jnp.take(embed_table, input_ids, axis=0)              # [B, S, E]
    emb_flat = emb.reshape(B * S, E)                            # dense MXU LHS
    maskf = attention_mask.astype(jnp.float32)
    # NOTE: rows with an all-zero attention_mask produce inf/NaN (matches torch 0/0).
    pool_w = maskf / maskf.sum(axis=1, keepdims=True)           # [B, S] mask/num_tokens

    has_dims = dimensions is not None
    if has_dims:
        # TODO(synk): PyTorch raises ValueError if any dimension <= 0; checking here
        # would require a host sync, so it is skipped.
        if max_dim is None:
            raise ValueError(
                "pass static max_dim=int(dimensions.max()) when dimensions is given "
                "(avoids a blocking device_get in the hot path)")
        dims2 = jnp.minimum(dimensions.astype(jnp.int32), jnp.int32(H))[:, None]
        max_dim_static = min(int(max_dim), H)
    else:
        dims2 = None
        max_dim_static = H

    if batch_tile is not None:
        if B % batch_tile:
            raise ValueError(f"batch_tile={batch_tile} must divide batch={B}")
        bt = batch_tile
    else:
        bt = _pick_batch_tile(B, S, target_m)
    tk = _pick_k_tile(E, k_tile)
    nb, nk = B // bt, E // tk
    # NOTE: on v7x keep nb >= 2 when possible so the "parallel" batch axis shards
    # across both TensorCores; for tiny inputs single-core execution is accepted.

    kernel = make_adapter_kernel(normalize=normalize, max_dim=max_dim_static,
                                 has_dims=has_dims)

    in_specs = [
        pl.BlockSpec((bt * S, tk), lambda b, k: (b, k)),   # flattened embeddings
        pl.BlockSpec((bt, S), lambda b, k: (b, 0)),        # pooling weights
    ]
    inputs = [emb_flat, pool_w]
    if has_dims:
        in_specs.append(pl.BlockSpec((bt, 1), lambda b, k: (b, 0)))   # matryoshka dims
        inputs.append(dims2)
    in_specs += [
        pl.BlockSpec((tk, H), lambda b, k: (k, 0)),        # W tile (streams over K)
        pl.BlockSpec((1, H), lambda b, k: (0, 0)),         # bias
    ]
    inputs += [w, bias]

    # Explicit VMEM budget: accumulator + double-buffered inputs/outputs + headroom,
    # capped at 48 MiB (safe within v7x's 64 MiB/TC, well inside v5e/v6e's 128 MiB).
    vmem_needed = (
        bt * S * H * 4                                      # f32 accumulator
        + 2 * bt * S * tk * emb_flat.dtype.itemsize         # emb double buffer
        + 2 * tk * H * w.dtype.itemsize                     # W double buffer
        + 2 * H * bias.dtype.itemsize                       # bias
        + 2 * bt * H * 4                                    # output double buffer
        + 2 * bt * S * 4 + 2 * bt * 4                       # pool weights + dims
    )
    vmem_limit = int(min(max(int(vmem_needed * 1.25) + (4 << 20), 16 << 20), 48 << 20))

    out = pl.pallas_call(
        kernel,
        out_shape=jax.ShapeDtypeStruct((B, H), jnp.float32),
        grid_spec=pltpu.PrefetchScalarGridSpec(
            num_scalar_prefetch=0,
            grid=(nb, nk),                                  # batch tiles x K tiles
            in_specs=in_specs,
            out_specs=pl.BlockSpec((bt, H), lambda b, k: (b, 0)),
            scratch_shapes=[pltpu.VMEM((bt * S, H), jnp.float32)],
        ),
        compiler_params=pltpu.CompilerParams(
            dimension_semantics=("parallel", "arbitrary"),  # batch axis -> megacore
            vmem_limit_bytes=vmem_limit),
    )(*inputs)

    if has_dims:
        out = out[:, :max_dim_static]    # static slice, no device sync
    return out


def _reference(input_ids, attention_mask, params, *, dimensions=None, normalize=True):
    """Pure-JAX reference mirroring the PyTorch module."""
    embed_table, w, bias = params
    emb = jnp.take(embed_table, input_ids, axis=0)
    hidden = (jnp.einsum("bse,eh->bsh", emb, w, preferred_element_type=jnp.float32)
              + bias.astype(jnp.float32))
    hidden = hidden.astype(jnp.bfloat16).astype(jnp.float32)        # HF bf16 -> .to(f32)
    m = attention_mask.astype(jnp.float32)
    pooled = (hidden * m[:, :, None]).sum(axis=1) / m.sum(axis=1, keepdims=True)
    if dimensions is not None:
        H = pooled.shape[1]
        clipped = jnp.minimum(dimensions.astype(jnp.int32), H)
        col = jnp.arange(H)[None, :]
        pooled = jnp.where(col >= clipped[:, None], -jnp.inf, pooled)
        pooled = pooled[:, : int(dimensions.max())]
    if normalize:
        nrm = jnp.sqrt(jnp.sum(pooled * pooled, axis=1, keepdims=True))
        pooled = pooled / jnp.maximum(nrm, 1e-12)
    return pooled


if __name__ == "__main__":
    key = jax.random.PRNGKey(0)
    k_emb, k_w, k_b, k_ids = jax.random.split(key, 4)

    VOCAB, B, S, E, H = 64, 2, 8, 32, 32

    # Deterministic synthetic "model" parameters (bf16, like an HF checkpoint).
    embed_table = (0.05 * jax.random.normal(k_emb, (VOCAB, E))).astype(jnp.bfloat16)
    w = (0.05 * jax.random.normal(k_w, (E, H))).astype(jnp.bfloat16)
    bias = (0.05 * jax.random.normal(k_b, (1, H))).astype(jnp.bfloat16)
    params = (embed_table, w, bias)

    input_ids = jax.random.randint(k_ids, (B, S), 0, VOCAB, dtype=jnp.int32)
    attention_mask = jnp.array(
        [[1, 1, 1, 1, 1, 1, 1, 1],
         [1, 1, 1, 1, 1, 0, 0, 0]], dtype=jnp.int32)

    # ---- path 1: no Matryoshka dimensions ----
    out = llama_bidirectional_adapter(
        input_ids, attention_mask, params, dimensions=None, normalize=True)
    out = jax.block_until_ready(out)
    ref = _reference(input_ids, attention_mask, params, dimensions=None, normalize=True)
    assert out.shape == (B, H) and out.dtype == jnp.float32
    assert jnp.allclose(out, ref, rtol=1e-3, atol=1e-3), "mismatch vs reference (no dims)"

    # ---- path 2: Matryoshka dimensions (per-row truncation, torch semantics incl. NaN) ----
    dims = jnp.array([24, 16], dtype=jnp.int32)
    out2 = llama_bidirectional_adapter(
        input_ids, attention_mask, params, dimensions=dims, max_dim=24, normalize=True)
    out2 = jax.block_until_ready(out2)
    ref2 = _reference(input_ids, attention_mask, params, dimensions=dims, normalize=True)
    assert out2.shape == (B, 24)
    assert jnp.allclose(out2, ref2, rtol=1e-3, atol=1e-3, equal_nan=True), \
        "mismatch vs reference (with dims)"

    print("KERNEL_OK")
</pallas_src>

<mosaic_0001>
module attributes {stable_mosaic.version = 11 : i64} {
  func.func @kernel(%arg0: i32, %arg1: i32, %arg2: memref<16x32xbf16, #tpu.memory_space<vmem>>, %arg3: memref<2x8xf32, #tpu.memory_space<vmem>>, %arg4: memref<32x32xbf16, #tpu.memory_space<vmem>>, %arg5: memref<1x32xbf16, #tpu.memory_space<vmem>>, %arg6: memref<2x32xf32, #tpu.memory_space<vmem>>, %arg7: memref<16x32xf32, #tpu.memory_space<vmem>>) attributes {dimension_semantics = [#tpu.dimension_semantics<parallel>, #tpu.dimension_semantics<arbitrary>], iteration_bounds = array<i64: 1, 1>, scalar_prefetch = 0 : i64, scratch_operands = 1 : i64, tpu.core_type = #tpu.core_type<tc>, window_params = [{transform_indices = @transform_0, window_bounds = array<i64: 16, 32>}, {transform_indices = @transform_1, window_bounds = array<i64: 2, 8>}, {transform_indices = @transform_2, window_bounds = array<i64: 32, 32>}, {pipeline_mode = #tpu.pipeline_mode<synchronous>, transform_indices = @transform_3, window_bounds = array<i64: 1, 32>}, {transform_indices = @transform_4, window_bounds = array<i64: 2, 32>}]} {
    %c0 = arith.constant 0 : index
    %c0_0 = arith.constant 0 : index
    %0 = vector.load %arg2[%c0, %c0_0] : memref<16x32xbf16, #tpu.memory_space<vmem>>, vector<16x32xbf16>
    %c0_1 = arith.constant 0 : index
    %c0_2 = arith.constant 0 : index
    %1 = vector.load %arg4[%c0_1, %c0_2] : memref<32x32xbf16, #tpu.memory_space<vmem>>, vector<32x32xbf16>
    %cst = arith.constant dense<0.000000e+00> : vector<16x32xf32>
    %2 = tpu.matmul %0, %1, %cst {dimension_numbers = #tpu.dot_dimension_numbers<[1], [0], [0], [1], [0, 0, 1, 1], [], []>} : vector<16x32xbf16>, vector<32x32xbf16>, vector<16x32xf32> -> vector<16x32xf32>
    %c0_i32 = arith.constant 0 : i32
    %3 = arith.cmpi eq, %arg1, %c0_i32 : i32
    %4 = arith.extui %3 : i1 to i32
    %c0_i32_3 = arith.constant 0 : i32
    %5 = arith.cmpi ne, %4, %c0_i32_3 : i32
    scf.if %5 {
      %c0_8 = arith.constant 0 : index
      %c0_9 = arith.constant 0 : index
      %12 = vector.load %arg5[%c0_8, %c0_9] : memref<1x32xbf16, #tpu.memory_space<vmem>>, vector<1x32xbf16>
      %13 = arith.extf %12 : vector<1x32xbf16> to vector<1x32xf32>
      %14 = vector.broadcast %13 : vector<1x32xf32> to vector<16x32xf32>
      %15 = arith.addf %2, %14 : vector<16x32xf32>
      %c0_10 = arith.constant 0 : index
      %c0_11 = arith.constant 0 : index
      %16 = vector.load %arg7[%c0_10, %c0_11] : memref<16x32xf32, #tpu.memory_space<vmem>>, vector<16x32xf32>
      tpu.vector_store %arg7[%c0_10, %c0_11], %15 {strides = array<i32>} : memref<16x32xf32, #tpu.memory_space<vmem>>, vector<16x32xf32>,
    } else {
    }
    %c0_i32_4 = arith.constant 0 : i32
    %6 = arith.cmpi sgt, %arg1, %c0_i32_4 : i32
    %7 = arith.extui %6 : i1 to i32
    %c0_i32_5 = arith.constant 0 : i32
    %8 = arith.cmpi ne, %7, %c0_i32_5 : i32
    scf.if %8 {
      %c0_8 = arith.constant 0 : index
      %c0_9 = arith.constant 0 : index
      %12 = vector.load %arg7[%c0_8, %c0_9] : memref<16x32xf32, #tpu.memory_space<vmem>>, vector<16x32xf32>
      %13 = arith.addf %12, %2 : vector<16x32xf32>
      %c0_10 = arith.constant 0 : index
      %c0_11 = arith.constant 0 : index
      %14 = vector.load %arg7[%c0_10, %c0_11] : memref<16x32xf32, #tpu.memory_space<vmem>>, vector<16x32xf32>
      tpu.vector_store %arg7[%c0_10, %c0_11], %13 {strides = array<i32>} : memref<16x32xf32, #tpu.memory_space<vmem>>, vector<16x32xf32>,
    } else {
    }
    %c0_i32_6 = arith.constant 0 : i32
    %9 = arith.cmpi eq, %arg1, %c0_i32_6 : i32
    %10 = arith.extui %9 : i1 to i32
    %c0_i32_7 = arith.constant 0 : i32
    %11 = arith.cmpi ne, %10, %c0_i32_7 : i32
    scf.if %11 {
      %c0_8 = arith.constant 0 : index
      %c0_9 = arith.constant 0 : index
      %12 = vector.load %arg7[%c0_8, %c0_9] : memref<16x32xf32, #tpu.memory_space<vmem>>, vector<16x32xf32>
      %13 = arith.truncf %12 : vector<16x32xf32> to vector<16x32xbf16>
      %14 = arith.extf %13 : vector<16x32xbf16> to vector<16x32xf32>
      %15 = vector.shape_cast %14 : vector<16x32xf32> to vector<2x8x32xf32>
      %c0_10 = arith.constant 0 : index
      %c0_11 = arith.constant 0 : index
      %16 = vector.load %arg3[%c0_10, %c0_11] : memref<2x8xf32, #tpu.memory_space<vmem>>, vector<2x8xf32>
      %17 = vector.shape_cast %16 : vector<2x8xf32> to vector<2x8x1xf32>
      %18 = vector.broadcast %17 : vector<2x8x1xf32> to vector<2x8x32xf32>
      %19 = arith.mulf %15, %18 : vector<2x8x32xf32>
      %cst_12 = arith.constant dense<0.000000e+00> : vector<2x32xf32>
      %20 = vector.multi_reduction <add>, %19, %cst_12 [1] : vector<2x8x32xf32> to vector<2x32xf32>
      %21 = arith.mulf %20, %20 : vector<2x32xf32>
      %cst_13 = arith.constant dense<0.000000e+00> : vector<2xf32>
      %22 = vector.multi_reduction <add>, %21, %cst_13 [1] : vector<2x32xf32> to vector<2xf32>
      %23 = vector.shape_cast %22 : vector<2xf32> to vector<2x1xf32>
      %cst_14 = arith.constant 9.99999996E-13 : f32
      %cst_15 = arith.constant 9.99999996E-13 : f32
      %24 = arith.mulf %cst_14, %cst_15 : f32
      %25 = vector.broadcast %24 : f32 to vector<2x1xf32>
      %26 = arith.cmpf oge, %23, %25 : vector<2x1xf32>
      %27 = math.rsqrt %23 : vector<2x1xf32>
      %cst_16 = arith.constant 9.99999995E+11 : f32
      %28 = vector.broadcast %cst_16 : f32 to vector<2x1xf32>
      %29 = arith.select %26, %27, %28 : vector<2x1xi1>, vector<2x1xf32>
      %30 = vector.broadcast %29 : vector<2x1xf32> to vector<2x32xf32>
      %31 = arith.mulf %20, %30 : vector<2x32xf32>
      %c0_17 = arith.constant 0 : index
      %c0_18 = arith.constant 0 : index
      %32 = vector.load %arg6[%c0_17, %c0_18] : memref<2x32xf32, #tpu.memory_space<vmem>>, vector<2x32xf32>
      tpu.vector_store %arg6[%c0_17, %c0_18], %31 {strides = array<i32>} : memref<2x32xf32, #tpu.memory_space<vmem>>, vector<2x32xf32>,
    } else {
    }
    return
  }
  func.func @transform_0(%arg0: i32, %arg1: i32) -> (i32, i32) {
    %c0_i32 = arith.constant 0 : i32
    return %arg0, %arg1 : i32, i32
  }
  func.func @transform_1(%arg0: i32, %arg1: i32) -> (i32, i32) {
    %c0_i32 = arith.constant 0 : i32
    %c0_i32_0 = arith.constant 0 : i32
    return %arg0, %c0_i32 : i32, i32
  }
  func.func @transform_2(%arg0: i32, %arg1: i32) -> (i32, i32) {
    %c0_i32 = arith.constant 0 : i32
    %c0_i32_0 = arith.constant 0 : i32
    return %arg1, %c0_i32 : i32, i32
  }
  func.func @transform_3(%arg0: i32, %arg1: i32) -> (i32, i32) {
    %c0_i32 = arith.constant 0 : i32
    %c0_i32_0 = arith.constant 0 : i32
    %c0_i32_1 = arith.constant 0 : i32
    return %c0_i32, %c0_i32_0 : i32, i32
  }
  func.func @transform_4(%arg0: i32, %arg1: i32) -> (i32, i32) {
    %c0_i32 = arith.constant 0 : i32
    %c0_i32_0 = arith.constant 0 : i32
    return %arg0, %c0_i32 : i32, i32
  }
}

</mosaic_0001>

<bundles_post_ra>
// kernel: tpu_custom_call.1
= control target key start
LH: loop header
LB: loop body
LE: loop exit
PB: predicated region body
PF: predicated region fallthrough
CT: control target
= control target key end

     0   :  { %9 = vsyncpa [#allocation4], 0  ;;  %s402_s0 = inlined_call_operand.hbm [shape: bf16[16,32], index: 0, kind: input, shape index: {}]   ;;  %s403_s1 = inlined_call_operand.hbm [shape: f32[2,8], index: 1, kind: input, shape index: {}]   ;;  %s404_s2 = inlined_call_operand.hbm [shape: bf16[32,32], index: 2, kind: input, shape index: {}]   ;;  %s405_s3 = inlined_call_operand.vmem [shape: bf16[1,32], index: 3, kind: input, shape index: {}]   ;;  %s406_s4 = inlined_call_operand.hbm [shape: f32[2,32], index: 4, kind: output, shape index: {}]  }
   0x1   :  { %10 = vsyncpa [#allocation7], 0 }
   0x2   :  { %11 = vsyncpa [#allocation5], 0  ;;  %s345_s15 = smov [#allocation6]   ;;  %s346_s17 = smov [#allocation3]  }
   0x3   :  { %s30_s16 = sshll.u32 %s345_s15, 4  ;;  %s17_s18 = sshll.u32 %s346_s17, 4  ;;  %s31_s16 = int_to_ptr.vmem [resolvable:$true] %s30_s16  ;;  %s18_s18 = int_to_ptr.vmem [resolvable:$true] %s17_s18 }
   0x4   :  { %s267_s19 = scalar_lea.vmem %s31_s16, 32  ;;  %p272_p1 = scmp.lt.s32.totalorder %s31_s16, %s31_s16 }
   0x5   :  { %p268_p0 = scmp.ne.s32.totalorder %s31_s16, %s267_s19  ;;  %p273_p2 = scmp.lt.s32.totalorder %s267_s19, %s267_s19 }
   0x7   :  { %p274_p3 = por %p273_p2, %p272_p1 }
   0x9   :  { %p275_p4 = pnand %p274_p3, %p268_p0 }
   0xb   :  { %278 = shalt.err (!%p275_p4)
}
   0xc   :  { %33 = dma.hbm_to_vmem [thread:$0]  %s403_s1, 32, %s31_s16, [#allocation7]  }
   0xd   :  { %s287_s22 = scalar_lea.vmem %s18_s18, 128  ;;  %p292_p6 = scmp.lt.s32.totalorder %s18_s18, %s18_s18 }
   0xe   :  { %p288_p5 = scmp.ne.s32.totalorder %s18_s18, %s287_s22  ;;  %p293_p7 = scmp.lt.s32.totalorder %s287_s22, %s287_s22 }
  0x10   :  { %p294_p8 = por %p293_p7, %p292_p6 }
  0x12   :  { %p295_p9 = pnand %p294_p8, %p288_p5 }
  0x14   :  { %298 = shalt.err (!%p295_p9)
}
  0x15   :  { %s347_s23 = smov 64   ;;  %s348_s24 = smov 4  }
  0x16   :  { %23 = dma.hbm_to_vmem [thread:$0]  %s402_s0, 128, %s18_s18, [#allocation4], %s347_s23, %s347_s23, %s348_s24  }
  0x17   :  { %s349_s27 = smov [#allocation8]  }
  0x18   :  { %s39_s28 = sshll.u32 %s349_s27, 4  ;;  %s40_s28 = int_to_ptr.vmem [resolvable:$true] %s39_s28 }
  0x19   :  { %s307_s29 = scalar_lea.vmem %s40_s28, 256  ;;  %p312_p11 = scmp.lt.s32.totalorder %s40_s28, %s40_s28 }
  0x1a   :  { %p308_p10 = scmp.ne.s32.totalorder %s40_s28, %s307_s29  ;;  %p313_p12 = scmp.lt.s32.totalorder %s307_s29, %s307_s29 }
  0x1c   :  { %p314_p13 = por %p313_p12, %p312_p11 }
  0x1e   :  { %p315_p0 = pnand %p314_p13, %p308_p10 }
  0x20   :  { %318 = shalt.err (!%p315_p0)
}
  0x21   :  { %45 = dma.hbm_to_vmem [thread:$0]  %s404_s2, 256, %s40_s28, [#allocation7], %s347_s23, %s347_s23, %s348_s24  }
  0x22   :  { %339 = dma.done.wait [#allocation4], 128  }
  0x23   :  { %340 = vsyncadd [#allocation4], 4294967168 }
  0x24   :  { %341 = dma.done.wait [#allocation7], 288  }
  0x25   :  { %342 = vsyncadd [#allocation7], 4294967008  ;;  %v132_v0 = vlaneseq  ;;  %v350_v1 = vmov 0.0   ;;  %vm351_vm0 = vmmov 0   ;;  %v254_v3 = vld [vmem:[#allocation8 + $0x8] sm:$0xff]   ;;  %v255_v5 = vld [vmem:[#allocation8] sm:$0xff]  }
  0x26   :  { %238 = vmatprep.subr.bf16.mxu0 %v350_v1  ;;  %242 = vmatprep.mubr.msk.bf16.mxu0 %vm351_vm0, %v350_v1  ;;  %v158_v7 = vld [vmem:[#allocation6] sm:$0x3]  ;;  %v256_v9 = vld [vmem:[#allocation3] sm:$0xff]   ;;  %vm81_vm1 = vcmask 261120   ;;  %v130_v11 = vld [vmem:[%s405_s3] sm:$0x1] }
  0x27   :  { %v133_v2 = vshrl.u32 %v132_v0, 7  ;;  %239 = vmatpush3.bf16.msra.mxu0 %v254_v3  ;;  %v131_v12 = vunpack.c.l.bf16 %v130_v11  ;;  %vm193_vm2 = vcmask 1041409   ;;  %vm196_vm3 = vcmask 254976   ;;  %s352_s3 = smov [#allocation9]  }
  0x28   :  { %240 = vmatprep.subr.bf16.mxu0 %v350_v1  ;;  %s221_s5 = sshll.u32 %s352_s3, 4  ;;  %s222_s5 = int_to_ptr.vmem [resolvable:$true] %s221_s5 }
  0x29   :  { %v134_v4 = vsub.s32 0, %v133_v2  ;;  %v168_v6 = vsub.s32 1, %v133_v2  ;;  %s319_s6 = scalar_lea.vmem %s222_s5, 32  ;;  %p324_p2 = scmp.lt.s32.totalorder %s222_s5, %s222_s5 }
  0x2a   :  { %p320_p1 = scmp.ne.s32.totalorder %s222_s5, %s319_s6  ;;  %p325_p3 = scmp.lt.s32.totalorder %s319_s6, %s319_s6 }
  0x2b   :  { %v162_v8 = vrot.slane %v158_v7, %v134_v4  ;;  %241 = vmatpush3.bf16.msra.mxu0 %v255_v5  ;;  %v169_v10 = vrot.slane %v158_v7, %v168_v6  ;;  %v135_v13 = vrot.slane %v131_v12, %v134_v4 }
  0x2c   :  { %p326_p4 = por %p325_p3, %p324_p2 }
  0x2d   :  { %164 = vbcast.lane.b32.xlu0 %v162_v8, 256 }
  0x2e   :  { %243 = vmatmul.mubr.msk.bf16.vlgmr.msra.gmra.mxu0 %vm81_vm1, %v256_v9  ;;  %p327_p5 = pnand %p326_p4, %p320_p1 }
  0x31   :  { %171 = vbcast.lane.b32.xlu0 %v169_v10, 256 }
  0x9f   :  { %v165_v20 = vpop.permute.xlu0 %164 }
  0xa3   :  { %v172_v24 = vpop.permute.xlu0 %171 }
  0xee   :  { %v119_v14 = vpop.f32.mrf.mxu0 }
  0xef   :  { %v136_v15 = vadd.f32 %v135_v13, %v119_v14 }
  0xf0   :  { %v244_v16 = vpop.f32.mrf.mxu0 }
  0xf1   :  { %138 = vst.msk [vmem:[#allocation2] sm:$0xff] %vm81_vm1, %v136_v15 }
  0xf2   :  { %v122_v17 = vpop.f32.mrf.mxu0 }
  0xf3   :  { %v137_v18 = vadd.f32 %v135_v13, %v122_v17 }
  0xf4   :  { %v245_v19 = vpop.f32.mrf.mxu0 }
  0xf5   :  { %139 = vst.msk [vmem:[#allocation2 + $0x8] sm:$0xff] %vm81_vm1, %v137_v18 }
  0xf8   :  { %v153_v21 = vld [vmem:[#allocation2] sm:$0xff] }
  0xfc   :  { %v154_v22 = vld [vmem:[#allocation2 + $0x8] sm:$0xff] }
  0xfd   :  { %v155_v23 = vpack.c.bf16 %v154_v22, %v153_v21 }
  0xff   :  { %v156_v25 = vunpack.c.l.bf16 %v155_v23  ;;  %v157_v26 = vunpack.c.h.bf16 %v155_v23 }
 0x101   :  { %v173_v27 = vmul.f32 %v165_v20, %v156_v25  ;;  %v174_v28 = vmul.f32 %v172_v24, %v157_v26 }
 0x103   :  { %v175_v29 = vsel %vm81_vm1, %v173_v27, 0.0  ;;  %v182_v30 = vsel %vm81_vm1, %v174_v28, 0.0 }
 0x104   :  { %v176_v31 = vrot.slane %v175_v29, 4  ;;  %v183_v32 = vrot.slane %v182_v30, 4 }
 0x106   :  { %v177_v33 = vadd.f32 %v176_v31, %v175_v29  ;;  %v184_v34 = vadd.f32 %v183_v32, %v182_v30 }
 0x108   :  { %v178_v35 = vrot.slane %v177_v33, 2  ;;  %v185_v36 = vrot.slane %v184_v34, 2 }
 0x10a   :  { %v179_v37 = vadd.f32 %v178_v35, %v177_v33  ;;  %v186_v38 = vadd.f32 %v185_v36, %v184_v34 }
 0x10c   :  { %v180_v39 = vrot.slane %v179_v37, 1  ;;  %v187_v40 = vrot.slane %v186_v38, 1 }
 0x10e   :  { %v181_v41 = vadd.f32 %v180_v39, %v179_v37  ;;  %v188_v42 = vadd.f32 %v187_v40, %v186_v38 }
 0x110   :  { %v189_v43 = vmul.f32 %v181_v41, %v181_v41  ;;  %v190_v44 = vmul.f32 %v188_v42, %v188_v42 }
 0x112   :  { %v194_v45 = vsel %vm193_vm2, %v190_v44, %v189_v43 }
 0x113   :  { %v197_v46 = vsel %vm196_vm3, %v194_v45, 0.0 }
 0x114   :  { %198 = vadd.xlane.f32.xlu1 %v197_v46 }
 0x19d   :  { %v199_v47 = vpop.xlane.xlu1 %198 }
 0x19e   :  { %257 = vrsqrt.f32 %v199_v47  ;;  %vm200_vm4 = vcmp.ge.f32.partialorder %v199_v47, 1e-24 }
 0x1ab   :  { %v258_v48 = vpop.eup %257 }
 0x1ac   :  { %v202_v49 = vsel %vm200_vm4, %v258_v48, 1e+12 }
 0x1ad   :  { %v204_v50 = vrot.slane %v202_v49, 1  ;;  %v207_v52 = vmul.f32 %v202_v49, %v181_v41 }
 0x1af   :  { %v208_v51 = vmul.f32 %v204_v50, %v188_v42 }
 0x1b1   :  { %v211_v53 = vrot.slane %v208_v51, 7 }
 0x1b3   :  { %v212_v54 = vsel %vm193_vm2, %v211_v53, %v207_v52 }
 0x1b4   :  { %214 = vst.msk [vmem:[#allocation9] sm:$0x3] %vm196_vm3, %v212_v54 }
 0x1b5   :  { %330 = shalt.err (!%p327_p5)
}
 0x1b6   :  { %224 = dma.vmem_to_hbm [thread:$0]  %s222_s5, 32, %s406_s4, [#allocation5]  }
 0x1b7   :  { %343 = dma.done.wait [#allocation5], 32  }
 0x1b8   :  { %344 = vsyncadd [#allocation5], 4294967264 }
 0x1b9   :  { %228 = vsyncpa [#allocation4], 1 }
 0x1ba   :  { %229 = vsyncpa [#allocation7], 1 }
 0x1bb   :  { %230 = vsyncpa [#allocation5], 1 }

</bundles_post_ra>
